<compile_context>
chip_gen: v7x
topology: tpu7x:2x2x1
jax: 0.10.0
libtpu: 0.0.40
codegen_flags: <defaults>
</compile_context>

<pallas_src>
import functools

import jax
import jax.numpy as jnp
from jax.experimental import pallas as pl
from jax.experimental.pallas import tpu as pltpu

D_IN, D_H1, D_H2, D_OUT = 2, 10, 50, 1

# Packed-parameter buffer layout (f32, shape (72, 16)):
#   [0:10,   0:2 ] = w1   (torch layout [out, in] = [10, 2])
#   [0:10,   2:3 ] = b1   ([10, 1])
#   [16:66,  0:10] = w2   ([50, 10])
#   [16:66, 10:11] = b2   ([50, 1])
#   [16:66, 11:12] = w3^T ([50, 1])
#   [0:1,   12:13] = b3   ([1, 1])
_P_ROWS, _P_COLS = 72, 16
_W2_ROW = 16  # row offset of the w2/b2/w3 block inside the packed buffer


def pack_params(w1, b1, w2, b2, w3, b3):
    # Guard the hand-packed layout against silent breakage if dims change.
    assert D_OUT == 1
    assert D_H1 <= _W2_ROW, "w1/b1 rows collide with w2 block"
    assert _W2_ROW + D_H2 <= _P_ROWS, "packed buffer too short for w2/b2/w3"
    assert D_IN + 1 <= _P_COLS and D_H1 + 3 <= _P_COLS, "packed buffer too narrow"
    assert w1.shape == (D_H1, D_IN) and b1.shape == (D_H1,)
    assert w2.shape == (D_H2, D_H1) and b2.shape == (D_H2,)
    assert w3.shape == (D_OUT, D_H2) and b3.shape == (D_OUT,)

    p = jnp.zeros((_P_ROWS, _P_COLS), jnp.float32)
    p = p.at[0:D_H1, 0:D_IN].set(w1.astype(jnp.float32))
    p = p.at[0:D_H1, D_IN].set(b1.astype(jnp.float32))
    p = p.at[_W2_ROW:_W2_ROW + D_H2, 0:D_H1].set(w2.astype(jnp.float32))
    p = p.at[_W2_ROW:_W2_ROW + D_H2, D_H1].set(b2.astype(jnp.float32))
    p = p.at[_W2_ROW:_W2_ROW + D_H2, D_H1 + 1].set(w3.astype(jnp.float32)[0, :])
    p = p.at[0, D_H1 + 2].set(b3.astype(jnp.float32)[0])
    return p


def _pick_compute_dtype():
    """bf16 activations on v6e/v7x (bf16 EUP/VPU), f32 elsewhere (v5e etc.)."""
    try:
        kind = jax.devices()[0].device_kind.lower()
    except Exception:  # no devices / unusual backend -> safe default
        return jnp.float32
    if ("v6" in kind) or ("v7" in kind) or ("7x" in kind):
        return jnp.bfloat16
    return jnp.float32


def _mlp_kernel(x_ref, p_ref, o_ref, *, compute_dtype):
    f32 = jnp.float32

    # Static slices of the packed, VMEM-resident parameter buffer.
    w1_a = p_ref[0:D_H1, 0:1]                                 # [10, 1]
    w1_b = p_ref[0:D_H1, 1:2]                                 # [10, 1]
    b1 = p_ref[0:D_H1, 2:3]                                   # [10, 1]
    w2 = p_ref[_W2_ROW:_W2_ROW + D_H2, 0:D_H1]                # [50, 10]
    b2 = p_ref[_W2_ROW:_W2_ROW + D_H2, D_H1:D_H1 + 1]         # [50, 1]
    w3 = p_ref[_W2_ROW:_W2_ROW + D_H2, D_H1 + 1:D_H1 + 2]     # [50, 1]
    b3 = p_ref[0:1, D_H1 + 2:D_H1 + 3]                        # [1, 1]

    x0 = x_ref[0:1, :]                                        # [1, TB]
    x1 = x_ref[1:2, :]                                        # [1, TB]

    # Layer 1 (2 -> 10): K=2 contraction as two broadcast FMAs on the VPU
    # (f32, VALU has slack); tanh pushed to the EUP in compute_dtype
    # (bf16 packs 10 rows into one vreg per column -> 1 EUP push, not 2).
    h1_pre = w1_a * x0 + w1_b * x1 + b1                       # [10, TB] f32
    h1 = jax.lax.tanh(h1_pre.astype(compute_dtype))           # native EUP tanh

    # Layer 2 (10 -> 50): the only contraction worth the MXU.
    # bf16-in / f32-accumulate on v6e/v7x, pure f32 on v5e.
    h2_pre = jnp.dot(w2.astype(compute_dtype), h1,
                     preferred_element_type=f32) + b2         # [50, TB] f32
    h2 = jax.lax.tanh(h2_pre.astype(compute_dtype))           # 4 pushes (bf16) vs 7 (f32)

    # Output layer (50 -> 1): broadcast-multiply + sublane reduce in f32
    # (VPU + XLU both have slack; keeping the reduce in f32 preserves accuracy).
    logit = jnp.sum(w3 * h2.astype(f32), axis=0, keepdims=True) + b3   # [1, TB]
    o_ref[...] = jax.nn.sigmoid(logit).astype(o_ref.dtype)    # lane-dense store


def three_layer_mlp(x, packed_params, *, block_b=4096, compute_dtype=None):
    """x: [B, 2] (PyTorch Linear convention). Returns [B, 1] float32.

    Call this under jax.jit so the layout plumbing (pad + cast + transpose)
    fuses into a single XLA copy instead of separate HBM passes.
    """
    assert block_b % 128 == 0 and block_b > 0
    if compute_dtype is None:
        compute_dtype = _pick_compute_dtype()

    B = x.shape[0]
    assert x.shape[1] == D_IN

    # ---- Static (trace-time) batch tiling --------------------------------
    b_lanes = pl.cdiv(B, 128) * 128            # lane-aligned batch
    n_steps = pl.cdiv(b_lanes, block_b)        # steps needed at block_b
    if b_lanes >= 256:
        # v7x megacore: make the "parallel" grid axis an even count >= 2 so
        # both TensorCores get equal work.  No cost on 1-TC v5e/v6e.
        n_steps = max(n_steps, 2)
        n_steps += n_steps % 2
    # Adaptive tail: derive the tile from B so padding stays < 128 per step
    # (padded columns burn real EUP cycles in this compute-bound kernel).
    tb = pl.cdiv(pl.cdiv(B, n_steps), 128) * 128
    b_pad = n_steps * tb

    # Layout plumbing: batch on the lane axis, zero-pad the ragged tail.
    # Under jit this fuses with the cast/transpose into one copy.
    xt = jnp.pad(x.astype(jnp.float32).T, ((0, 0), (0, b_pad - B)))

    kernel = functools.partial(_mlp_kernel, compute_dtype=compute_dtype)
    out_t = pl.pallas_call(
        kernel,
        out_shape=jax.ShapeDtypeStruct((D_OUT, b_pad), jnp.float32),
        grid=(n_steps,),
        in_specs=[
            pl.BlockSpec((D_IN, tb), lambda i: (0, i)),
            # Packed params: full array, constant index_map -> VMEM-resident.
            pl.BlockSpec((_P_ROWS, _P_COLS), lambda i: (0, 0)),
        ],
        out_specs=pl.BlockSpec((D_OUT, tb), lambda i: (0, i)),
        compiler_params=pltpu.CompilerParams(
            dimension_semantics=("parallel",)),
    )(xt, packed_params)

    return out_t[:, :B].T


def init_params(key):
    # torch.nn.Linear layout: W [out, in], b [out]; U(-1/sqrt(fan_in), 1/sqrt(fan_in)).
    def linear(k, fan_in, fan_out):
        kw, kb = jax.random.split(k)
        bound = 1.0 / jnp.sqrt(jnp.float32(fan_in))
        w = jax.random.uniform(kw, (fan_out, fan_in), jnp.float32, -bound, bound)
        b = jax.random.uniform(kb, (fan_out,), jnp.float32, -bound, bound)
        return w, b

    k1, k2, k3 = jax.random.split(key, 3)
    w1, b1 = linear(k1, D_IN, D_H1)
    w2, b2 = linear(k2, D_H1, D_H2)
    w3, b3 = linear(k3, D_H2, D_OUT)
    return (w1, b1, w2, b2, w3, b3)


if __name__ == "__main__":
    key = jax.random.PRNGKey(0)
    k_params, k_x, k_x2 = jax.random.split(key, 3)

    params = init_params(k_params)
    packed = pack_params(*params)

    w1, b1, w2, b2, w3, b3 = params

    def ref_fwd(x):  # pure-JAX f32 reference (same math, torch layout)
        return jax.nn.sigmoid(
            jnp.tanh(jnp.tanh(x @ w1.T + b1) @ w2.T + b2) @ w3.T + b3)

    cd = _pick_compute_dtype()
    atol = 2e-5 if cd == jnp.float32 else 4e-2   # bf16 activations -> ~1e-3 level error
    fwd = jax.jit(functools.partial(three_layer_mlp, compute_dtype=cd))

    # Primary small check (single-tile path).
    B = 8
    x = jax.random.normal(k_x, (B, D_IN), jnp.float32)
    out = jax.block_until_ready(fwd(x, packed))
    assert out.shape == (B, D_OUT), out.shape
    assert jnp.allclose(out, ref_fwd(x), atol=atol), "mismatch vs reference (B=8)"

    # Multi-step grid + ragged tail path (exercises the v7x 2-TC split logic).
    B2 = 300
    x2 = jax.random.normal(k_x2, (B2, D_IN), jnp.float32)
    out2 = jax.block_until_ready(fwd(x2, packed))
    assert out2.shape == (B2, D_OUT), out2.shape
    assert jnp.allclose(out2, ref_fwd(x2), atol=atol), "mismatch vs reference (B=300)"

    print("KERNEL_OK")
</pallas_src>

<mosaic_0001>
module attributes {stable_mosaic.version = 11 : i64} {
  func.func @_mlp_kernel(%arg0: i32, %arg1: memref<2x128xf32, #tpu.memory_space<vmem>>, %arg2: memref<72x16xf32, #tpu.memory_space<vmem>>, %arg3: memref<1x128xf32, #tpu.memory_space<vmem>>) attributes {dimension_semantics = [#tpu.dimension_semantics<parallel>], iteration_bounds = array<i64: 1>, scalar_prefetch = 0 : i64, scratch_operands = 0 : i64, tpu.core_type = #tpu.core_type<tc>, window_params = [{transform_indices = @transform_0, window_bounds = array<i64: 2, 128>}, {pipeline_mode = #tpu.pipeline_mode<synchronous>, transform_indices = @transform_1, window_bounds = array<i64: 72, 16>}, {transform_indices = @transform_2, window_bounds = array<i64: 1, 128>}]} {
    %c0 = arith.constant 0 : index
    %c0_0 = arith.constant 0 : index
    %0 = vector.load %arg2[%c0, %c0_0] : memref<72x16xf32, #tpu.memory_space<vmem>>, vector<10x1xf32>
    %c0_1 = arith.constant 0 : index
    %c1 = arith.constant 1 : index
    %1 = vector.load %arg2[%c0_1, %c1] : memref<72x16xf32, #tpu.memory_space<vmem>>, vector<10x1xf32>
    %c0_2 = arith.constant 0 : index
    %c2 = arith.constant 2 : index
    %2 = vector.load %arg2[%c0_2, %c2] : memref<72x16xf32, #tpu.memory_space<vmem>>, vector<10x1xf32>
    %c16 = arith.constant 16 : index
    %c0_3 = arith.constant 0 : index
    %3 = vector.load %arg2[%c16, %c0_3] : memref<72x16xf32, #tpu.memory_space<vmem>>, vector<50x10xf32>
    %c16_4 = arith.constant 16 : index
    %c10 = arith.constant 10 : index
    %4 = vector.load %arg2[%c16_4, %c10] : memref<72x16xf32, #tpu.memory_space<vmem>>, vector<50x1xf32>
    %c16_5 = arith.constant 16 : index
    %c11 = arith.constant 11 : index
    %5 = vector.load %arg2[%c16_5, %c11] : memref<72x16xf32, #tpu.memory_space<vmem>>, vector<50x1xf32>
    %c0_6 = arith.constant 0 : index
    %c12 = arith.constant 12 : index
    %6 = vector.load %arg2[%c0_6, %c12] : memref<72x16xf32, #tpu.memory_space<vmem>>, vector<1x1xf32>
    %c0_7 = arith.constant 0 : index
    %c0_8 = arith.constant 0 : index
    %7 = vector.load %arg1[%c0_7, %c0_8] : memref<2x128xf32, #tpu.memory_space<vmem>>, vector<1x128xf32>
    %c1_9 = arith.constant 1 : index
    %c0_10 = arith.constant 0 : index
    %8 = vector.load %arg1[%c1_9, %c0_10] : memref<2x128xf32, #tpu.memory_space<vmem>>, vector<1x128xf32>
    %9 = vector.broadcast %0 : vector<10x1xf32> to vector<10x128xf32>
    %10 = vector.broadcast %7 : vector<1x128xf32> to vector<10x128xf32>
    %11 = arith.mulf %9, %10 : vector<10x128xf32>
    %12 = vector.broadcast %1 : vector<10x1xf32> to vector<10x128xf32>
    %13 = vector.broadcast %8 : vector<1x128xf32> to vector<10x128xf32>
    %14 = arith.mulf %12, %13 : vector<10x128xf32>
    %15 = arith.addf %11, %14 : vector<10x128xf32>
    %16 = vector.broadcast %2 : vector<10x1xf32> to vector<10x128xf32>
    %17 = arith.addf %15, %16 : vector<10x128xf32>
    %18 = math.tanh %17 : vector<10x128xf32>
    %cst = arith.constant dense<0.000000e+00> : vector<50x128xf32>
    %19 = tpu.matmul %3, %18, %cst {dimension_numbers = #tpu.dot_dimension_numbers<[1], [0], [0], [1], [0, 0, 1, 1], [], []>} : vector<50x10xf32>, vector<10x128xf32>, vector<50x128xf32> -> vector<50x128xf32>
    %20 = vector.broadcast %4 : vector<50x1xf32> to vector<50x128xf32>
    %21 = arith.addf %19, %20 : vector<50x128xf32>
    %22 = math.tanh %21 : vector<50x128xf32>
    %23 = vector.broadcast %5 : vector<50x1xf32> to vector<50x128xf32>
    %24 = arith.mulf %23, %22 : vector<50x128xf32>
    %cst_11 = arith.constant dense<0.000000e+00> : vector<128xf32>
    %25 = vector.multi_reduction <add>, %24, %cst_11 [0] : vector<50x128xf32> to vector<128xf32>
    %26 = vector.shape_cast %25 : vector<128xf32> to vector<1x128xf32>
    %27 = vector.broadcast %6 : vector<1x1xf32> to vector<1x128xf32>
    %28 = arith.addf %26, %27 : vector<1x128xf32>
    %29 = arith.negf %28 : vector<1x128xf32>
    %30 = math.exp %29 : vector<1x128xf32>
    %cst_12 = arith.constant 1.000000e+00 : f32
    %31 = vector.broadcast %cst_12 : f32 to vector<1x128xf32>
    %32 = arith.addf %31, %30 : vector<1x128xf32>
    %33 = arith.divf %31, %32 : vector<1x128xf32>
    %c0_13 = arith.constant 0 : index
    %c0_14 = arith.constant 0 : index
    %34 = vector.load %arg3[%c0_13, %c0_14] : memref<1x128xf32, #tpu.memory_space<vmem>>, vector<1x128xf32>
    tpu.vector_store %arg3[%c0_13, %c0_14], %33 {strides = array<i32>} : memref<1x128xf32, #tpu.memory_space<vmem>>, vector<1x128xf32>,
    return
  }
  func.func @transform_0(%arg0: i32) -> (i32, i32) {
    %c0_i32 = arith.constant 0 : i32
    %c0_i32_0 = arith.constant 0 : i32
    return %c0_i32, %arg0 : i32, i32
  }
  func.func @transform_1(%arg0: i32) -> (i32, i32) {
    %c0_i32 = arith.constant 0 : i32
    %c0_i32_0 = arith.constant 0 : i32
    %c0_i32_1 = arith.constant 0 : i32
    return %c0_i32, %c0_i32_0 : i32, i32
  }
  func.func @transform_2(%arg0: i32) -> (i32, i32) {
    %c0_i32 = arith.constant 0 : i32
    %c0_i32_0 = arith.constant 0 : i32
    return %c0_i32, %arg0 : i32, i32
  }
}

</mosaic_0001>

<bundles_post_ra>
// kernel: three_layer_mlp.1
= control target key start
LH: loop header
LB: loop body
LE: loop exit
PB: predicated region body
PF: predicated region fallthrough
CT: control target
= control target key end

     0   :  { %v386_v0 = vmov 1   ;;  %v387_v1 = vmov 0   ;;  %v388_v4 = vmov 2   ;;  %v389_v5 = vmov 0.0|0.0   ;;  %s471_s1 = inlined_call_operand.vmem [shape: f32[72,16], index: 1, kind: input, shape index: {}]   ;;  %s472_s0 = inlined_call_operand.vmem [shape: f32[2,128], index: 0, kind: input, shape index: {}]   ;;  %s473_s2 = inlined_call_operand.vmem [shape: f32[1,128], index: 2, kind: output, shape index: {}]  }
   0x1   :  { %355 = vset.pattern.permute.xlu1 %v386_v0  ;;  %354 = vset.pattern.permute.xlu0 %v387_v1  ;;  %v11_v2 = vld [vmem:[%s471_s1] sm:$0xff]  ;;  %v12_v3 = vld [vmem:[%s471_s1 + $0x8] sm:$0x3]  ;;  %vm390_vm0 = vmmov 0   ;;  %v391_v6 = vmov 0.0   ;;  %v13_v7 = vld [vmem:[%s471_s1 + $0x10] sm:$0xff] }
   0x2   :  { %40 = vperm.xlu1 %355, %v11_v2   ;;  %25 = vperm.xlu0 %354, %v11_v2   ;;  %v427_v8 = vld [vmem:[%s471_s1 + $0x18] sm:$0xff]  ;;  %v392_v9 = vmov 10   ;;  %v17_v10 = vld [vmem:[%s471_s1 + $0x30] sm:$0xff]  ;;  %v15_v11 = vld [vmem:[%s471_s1 + $0x20] sm:$0xff]  ;;  %v393_v15 = vmov 11   ;;  %v394_v16 = vmov 12  }
   0x3   :  { %338 = vmatprep.subr.bf16.mxu0 %v389_v5  ;;  %342 = vmatprep.subr.bf16.mxu1 %v389_v5  ;;  %v19_v12 = vld [vmem:[%s471_s1 + $0x40] sm:$0x3]  ;;  %v16_v13 = vld [vmem:[%s471_s1 + $0x28] sm:$0xff]  ;;  %v18_v14 = vld [vmem:[%s471_s1 + $0x38] sm:$0xff]  ;;  %vm117_vm1 = vcmask 1041408   ;;  %vm395_vm2 = vmmov 1  }
   0x4   :  { %317 = vmatprep.mubr.msk.f32.mxu0 %vm390_vm0, %v391_v6  ;;  %329 = vmatprep.mubr.msk.f32.mxu1 %vm390_vm0, %v391_v6  ;;  %v20_v17 = vld [vmem:[%s471_s1] sm:$0x1]  ;;  %v294_v20 = vld [vmem:[%s472_s0 + $0x1] ss:$0 sm:$0xff]  ;;  %vm340_vm3 = vmpackc.low %vm117_vm1, %vm395_vm2  ;;  %vm102_vm4 = vcmask 80896  }
   0x5   :  { %v293_v21 = vld [vmem:[%s472_s0] ss:$0 sm:$0xff] }
   0x6   :  { %44 = vperm.xlu1 %355, %v12_v3   ;;  %30 = vperm.xlu0 %354, %v12_v3  }
   0xa   :  { %357 = vset.pattern.permute.xlu1 %v388_v4  ;;  %356 = vset.pattern.permute.xlu0 %v388_v4 }
   0xb   :  { %60 = vperm.xlu1 %357, %v12_v3   ;;  %56 = vperm.xlu0 %356, %v11_v2  }
   0xf   :  { %358 = vset.pattern.permute.xlu1 %v392_v9  ;;  %359 = vset.pattern.permute.xlu0 %v392_v9 }
  0x10   :  { %69 = vperm.xlu1 %358, %v13_v7   ;;  %74 = vperm.xlu0 %359, %v427_v8  }
  0x14   :  { %79 = vperm.xlu1 %358, %v15_v11   ;;  %89 = vperm.xlu0 %359, %v17_v10  }
  0x18   :  { %84 = vperm.xlu1 %358, %v16_v13   ;;  %99 = vperm.xlu0 %359, %v19_v12  }
  0x1c   :  { %94 = vperm.xlu1 %358, %v18_v14   ;;  %361 = vset.pattern.permute.xlu0 %v393_v15 }
  0x1d   :  { %233 = vperm.xlu0 %361, %v427_v8  }
  0x20   :  { %360 = vset.pattern.permute.xlu1 %v393_v15 }
  0x21   :  { %229 = vperm.xlu1 %360, %v13_v7   ;;  %245 = vperm.xlu0 %361, %v17_v10  }
  0x25   :  { %237 = vperm.xlu1 %360, %v15_v11   ;;  %253 = vperm.xlu0 %361, %v19_v12  }
  0x29   :  { %241 = vperm.xlu1 %360, %v16_v13   ;;  %363 = vset.pattern.permute.xlu0 %v394_v16 }
  0x2d   :  { %249 = vperm.xlu1 %360, %v18_v14  }
  0x31   :  { %362 = vset.pattern.permute.xlu1 %v394_v16 }
  0x32   :  { %278 = vperm.xlu1 %362, %v20_v17  }
  0x81   :  { %v41_v18 = vpop.permute.xlu1 %40  ;;  %v26_v19 = vpop.permute.xlu0 %25 }
  0x82   :  { %v51_v22 = vmul.f32 %v294_v20, %v41_v18  ;;  %v37_v23 = vmul.f32 %v293_v21, %v26_v19 }
  0x84   :  { %v53_v29 = vadd.f32 %v51_v22, %v37_v23 }
  0x85   :  { %v45_v24 = vpop.permute.xlu1 %44  ;;  %v31_v25 = vpop.permute.xlu0 %30 }
  0x86   :  { %v52_v26 = vmul.f32 %v294_v20, %v45_v24  ;;  %v38_v27 = vmul.f32 %v293_v21, %v31_v25 }
  0x88   :  { %v54_v28 = vadd.f32 %v52_v26, %v38_v27 }
  0x8a   :  { %v61_v30 = vpop.permute.xlu1 %60  ;;  %v57_v31 = vpop.permute.xlu0 %56 }
  0x8b   :  { %v64_v32 = vadd.f32 %v61_v30, %v54_v28  ;;  %v63_v33 = vadd.f32 %v57_v31, %v53_v29 }
  0x8d   :  { %364 = vtanh.f32 %v64_v32 }
  0x8e   :  { %366 = vtanh.f32 %v63_v33 }
  0x8f   :  { %v70_v37 = vpop.permute.xlu1 %69  ;;  %v75_v40 = vpop.permute.xlu0 %74 }
  0x93   :  { %v80_v38 = vpop.permute.xlu1 %79  ;;  %v90_v42 = vpop.permute.xlu0 %89 }
  0x97   :  { %v365_v34 = vpop.eup %364  ;;  %v85_v39 = vpop.permute.xlu1 %84 }
  0x98   :  { %v367_v35 = vpop.eup %366  ;;  %v100_v54 = vpop.permute.xlu0 %99 }
  0x99   :  { %v339_v36 = vpack.c.bf16 %v365_v34, %v367_v35 }
  0x9b   :  { %341 = vmatpush3.bf16.msk.msra.mxu0 %vm340_vm3, %v339_v36  ;;  %343 = vmatpush3.bf16.msk.msra.mxu1 %vm340_vm3, %v339_v36  ;;  %v95_v41 = vpop.permute.xlu1 %94 }
  0x9c   :  { %v234_v2 = vpop.permute.xlu0 %233 }
  0x9e   :  { %318 = vmatmul.mubr.msk.f32.vlgmr.msra.gmra.mrb[0].mxu0 %vm102_vm4, %v13_v7  ;;  %330 = vmatmul.mubr.msk.f32.vlgmr.msra.gmra.mrb[0].mxu1 %vm102_vm4, %v17_v10 }
  0x9f   :  { %320 = vmatprep.mubr.msk.f32.mxu0 %vm390_vm0, %v391_v6  ;;  %332 = vmatprep.mubr.msk.f32.mxu1 %vm390_vm0, %v391_v6 }
  0xa0   :  { %v230_v53 = vpop.permute.xlu1 %229  ;;  %v246_v9 = vpop.permute.xlu0 %245 }
  0xa2   :  { %321 = vmatmul.mubr.msk.f32.gmra.mrb[2].mxu0 %vm102_vm4, %v427_v8  ;;  %333 = vmatmul.mubr.msk.f32.gmra.mrb[2].mxu1 %vm102_vm4, %v18_v14 }
  0xa3   :  { %323 = vmatprep.mubr.msk.f32.mxu0 %vm390_vm0, %v391_v6  ;;  %335 = vmatprep.mubr.msk.f32.mxu1 %vm390_vm0, %v391_v6 }
  0xa4   :  { %v238_v4 = vpop.permute.xlu1 %237  ;;  %v254_v18 = vpop.permute.xlu0 %253 }
  0xa6   :  { %324 = vmatmul.mubr.msk.f32.gmra.mrb[4].mxu0 %vm102_vm4, %v15_v11  ;;  %336 = vmatmul.mubr.msk.f32.gmra.mrb[4].mxu1 %vm102_vm4, %v19_v12 }
  0xa7   :  { %326 = vmatprep.mubr.msk.f32.mxu0 %vm390_vm0, %v391_v6 }
  0xa8   :  { %v242_v11 = vpop.permute.xlu1 %241 }
  0xaa   :  { %327 = vmatmul.mubr.msk.f32.gmra.mrb[6].mxu0 %vm102_vm4, %v16_v13 }
  0xac   :  { %v250_v20 = vpop.permute.xlu1 %249 }
  0xb1   :  { %v279_v34 = vpop.permute.xlu1 %278 }
 0x171   :  { %v187_v43 = vpop.f32.mrb[0].mxu0  ;;  %v207_v44 = vpop.f32.mrb[0].mxu1 }
 0x172   :  { %v188_v45 = vadd.f32 %v187_v43, %v70_v37  ;;  %v319_v46 = vpop.f32.mrb[1].mxu0  ;;  %v331_v47 = vpop.f32.mrb[1].mxu1  ;;  %v208_v60 = vadd.f32 %v207_v44, %v90_v42 }
 0x174   :  { %368 = vtanh.f32 %v188_v45 }
 0x175   :  { %v192_v48 = vpop.f32.mrb[2].mxu0  ;;  %v212_v49 = vpop.f32.mrb[2].mxu1 }
 0x176   :  { %v193_v50 = vadd.f32 %v192_v48, %v75_v40  ;;  %v322_v51 = vpop.f32.mrb[3].mxu0  ;;  %v334_v52 = vpop.f32.mrb[3].mxu1  ;;  %v213_v63 = vadd.f32 %v212_v49, %v95_v41 }
 0x178   :  { %370 = vtanh.f32 %v193_v50 }
 0x179   :  { %v197_v55 = vpop.f32.mrb[4].mxu0  ;;  %v217_v56 = vpop.f32.mrb[4].mxu1 }
 0x17a   :  { %v198_v57 = vadd.f32 %v197_v55, %v80_v38  ;;  %v325_v58 = vpop.f32.mrb[5].mxu0  ;;  %v337_v59 = vpop.f32.mrb[5].mxu1  ;;  %v218_v61 = vadd.f32 %v217_v56, %v100_v54 }
 0x17c   :  { %372 = vtanh.f32 %v198_v57 }
 0x17d   :  { %v202_v62 = vpop.f32.mrb[6].mxu0  ;;  %374 = vtanh.f32 %v208_v60 }
 0x17e   :  { %v203_v0 = vadd.f32 %v202_v62, %v85_v39  ;;  %v328_v1 = vpop.f32.mrb[7].mxu0  ;;  %v369_v3 = vpop.eup %368 }
 0x17f   :  { %v256_v6 = vmul.f32 %v369_v3, %v230_v53 }
 0x180   :  { %376 = vtanh.f32 %v203_v0 }
 0x181   :  { %378 = vtanh.f32 %v218_v61 }
 0x182   :  { %v371_v5 = vpop.eup %370  ;;  %380 = vtanh.f32 %v213_v63 }
 0x183   :  { %v257_v7 = vmul.f32 %v371_v5, %v234_v2 }
 0x185   :  { %v263_v8 = vadd.f32 %v257_v7, %v256_v6 }
 0x186   :  { %v373_v10 = vpop.eup %372 }
 0x187   :  { %v258_v12 = vmul.f32 %v373_v10, %v238_v4  ;;  %v375_v13 = vpop.eup %374 }
 0x188   :  { %v260_v21 = vmul.f32 %v375_v13, %v246_v9 }
 0x189   :  { %v264_v14 = vadd.f32 %v263_v8, %v258_v12 }
 0x18a   :  { %v377_v15 = vpop.eup %376 }
 0x18b   :  { %v379_v16 = vpop.eup %378  ;;  %v259_v17 = vmul.f32 %v377_v15, %v242_v11 }
 0x18c   :  { %v381_v19 = vpop.eup %380  ;;  %v262_v23 = vmul.f32 %v379_v16, %v254_v18 }
 0x18d   :  { %v265_v22 = vadd.f32 %v264_v14, %v259_v17  ;;  %v261_v24 = vmul.f32 %v381_v19, %v250_v20 }
 0x18e   :  { %v268_v27 = vsel %vm117_vm1, %v262_v23, 0.0 }
 0x18f   :  { %v266_v25 = vadd.f32 %v265_v22, %v260_v21 }
 0x191   :  { %v267_v26 = vadd.f32 %v266_v25, %v261_v24 }
 0x193   :  { %v269_v28 = vadd.f32 %v268_v27, %v267_v26 }
 0x195   :  { %v270_v29 = vrot.slane %v269_v28, 4 }
 0x197   :  { %v271_v30 = vadd.f32 %v270_v29, %v269_v28 }
 0x199   :  { %v272_v31 = vrot.slane %v271_v30, 2 }
 0x19b   :  { %v273_v32 = vadd.f32 %v272_v31, %v271_v30 }
 0x19d   :  { %v274_v33 = vrot.slane %v273_v32, 1 }
 0x19f   :  { %v275_v35 = vadd.f32 %v274_v33, %v273_v32 }
 0x1a1   :  { %v281_v36 = vadd.f32 %v279_v34, %v275_v35 }
 0x1a3   :  { %v303_v37 = vmul.f32 -1.442695, %v281_v36 }
 0x1a5   :  { %382 = vpow2.f32 %v303_v37 }
 0x1af   :  { %v383_v38 = vpop.eup %382 }
 0x1b0   :  { %v285_v39 = vadd.f32 1.0, %v383_v38 }
 0x1b2   :  { %384 = vrcp.f32 %v285_v39 }
 0x1bc   :  { %v385_v40 = vpop.eup %384 }
 0x1bd   :  { %288 = vst [vmem:[%s473_s2] sm:$0x1] %v385_v40 }

</bundles_post_ra>
